<compile_context>
chip_gen: v7x
topology: tpu7x:2x2x1
jax: 0.10.0
libtpu: 0.0.40
codegen_flags: <defaults>
</compile_context>

<pallas_src>
import functools

import jax
import jax.numpy as jnp
from jax import lax
from jax.experimental import pallas as pl
from jax.experimental.pallas import tpu as pltpu


def _attention_kernel(x_ref, pos_ref, wq_ref, wk_ref, wv_ref,
                      bq_ref, bk_ref, bv_ref, o_ref, *, d_model):
    # x_ref: (N, D) block for the current batch element (batch dim squeezed).
    x = x_ref[...].astype(jnp.float32) + pos_ref[...].astype(jnp.float32)

    wq = wq_ref[...].astype(jnp.float32)
    wk = wk_ref[...].astype(jnp.float32)
    wv = wv_ref[...].astype(jnp.float32)

    # Linear projections (MXU, f32 accumulation), biases broadcast over rows.
    q = jnp.dot(x, wq, preferred_element_type=jnp.float32) + bq_ref[...].astype(jnp.float32)
    k = jnp.dot(x, wk, preferred_element_type=jnp.float32) + bk_ref[...].astype(jnp.float32)
    v = jnp.dot(x, wv, preferred_element_type=jnp.float32) + bv_ref[...].astype(jnp.float32)

    # Scaled dot-product scores: (N, D) @ (D, N) -> (N, N).
    scale = jnp.float32(1.0 / (d_model ** 0.5))
    scores = jnp.dot(q, k.T, preferred_element_type=jnp.float32) * scale

    # Numerically-stable softmax along the key axis, all in f32.
    m = jnp.max(scores, axis=-1, keepdims=True)
    p = jnp.exp(scores - m)                       # EUP
    denom = jnp.sum(p, axis=-1, keepdims=True)
    attn = p * pl.reciprocal(denom)               # EUP reciprocal, exact

    # Weighted sum of values: (N, N) @ (N, D) -> (N, D); single downcast+store.
    out = jnp.dot(attn, v, preferred_element_type=jnp.float32)
    o_ref[...] = out.astype(o_ref.dtype)


def attention_mechanism(clusters, pos_encoding, wq, wk, wv, bq, bk, bv):
    """clusters: (B, N, D); pos: (N, D); w*: (D, D) (already in x@W form); b*: (1, D)."""
    B, N, D = clusters.shape
    kernel = functools.partial(_attention_kernel, d_model=D)

    shared = lambda b: (0, 0)           # weights / pos / biases: same block every step
    per_batch = lambda b: (b, 0, 0)     # one batch element per grid step

    return pl.pallas_call(
        kernel,
        out_shape=jax.ShapeDtypeStruct((B, N, D), clusters.dtype),
        grid_spec=pltpu.PrefetchScalarGridSpec(
            num_scalar_prefetch=0,
            grid=(B,),
            in_specs=[
                pl.BlockSpec((None, N, D), per_batch),   # clusters (batch squeezed)
                pl.BlockSpec((N, D), shared),            # pos_encoding
                pl.BlockSpec((D, D), shared),            # Wq
                pl.BlockSpec((D, D), shared),            # Wk
                pl.BlockSpec((D, D), shared),            # Wv
                pl.BlockSpec((1, D), shared),            # bq
                pl.BlockSpec((1, D), shared),            # bk
                pl.BlockSpec((1, D), shared),            # bv
            ],
            out_specs=pl.BlockSpec((None, N, D), per_batch),
        ),
        compiler_params=pltpu.CompilerParams(
            dimension_semantics=("parallel",),   # batch is embarrassingly parallel
        ),
    )(clusters, pos_encoding, wq, wk, wv, bq, bk, bv)


def _reference(clusters, pos_encoding, wq, wk, wv, bq, bk, bv):
    """Pure-JAX replica of the PyTorch forward (for verification)."""
    hi = lax.Precision.HIGHEST
    d = clusters.shape[-1]
    x = clusters.astype(jnp.float32) + pos_encoding.astype(jnp.float32)[None]
    q = jnp.einsum("bnd,de->bne", x, wq, precision=hi) + bq
    k = jnp.einsum("bnd,de->bne", x, wk, precision=hi) + bk
    v = jnp.einsum("bnd,de->bne", x, wv, precision=hi) + bv
    scores = jnp.einsum("bqd,bkd->bqk", q, k, precision=hi) / (d ** 0.5)
    w = jax.nn.softmax(scores, axis=-1)
    out = jnp.einsum("bqk,bkd->bqd", w, v, precision=hi)
    return out.astype(clusters.dtype)


if __name__ == "__main__":
    B, N, D = 2, 8, 128   # batch, n_clusters, d_model (lane-dense feature dim)
    key = jax.random.PRNGKey(0)
    ks = jax.random.split(key, 8)

    clusters = jax.random.normal(ks[0], (B, N, D), dtype=jnp.float32)
    pos = jax.random.normal(ks[1], (N, D), dtype=jnp.float32)
    # Weights stored so the kernel computes x @ W + b (equivalent to nn.Linear
    # with W_linear = W.T); scaled to keep activations O(1).
    wq = jax.random.normal(ks[2], (D, D), dtype=jnp.float32) / jnp.sqrt(D)
    wk = jax.random.normal(ks[3], (D, D), dtype=jnp.float32) / jnp.sqrt(D)
    wv = jax.random.normal(ks[4], (D, D), dtype=jnp.float32) / jnp.sqrt(D)
    bq = 0.1 * jax.random.normal(ks[5], (1, D), dtype=jnp.float32)
    bk = 0.1 * jax.random.normal(ks[6], (1, D), dtype=jnp.float32)
    bv = 0.1 * jax.random.normal(ks[7], (1, D), dtype=jnp.float32)

    out = attention_mechanism(clusters, pos, wq, wk, wv, bq, bk, bv)
    out = jax.block_until_ready(out)

    ref = _reference(clusters, pos, wq, wk, wv, bq, bk, bv)
    assert out.shape == (B, N, D) and out.dtype == clusters.dtype
    assert jnp.allclose(out, ref, atol=2e-3, rtol=2e-3), "mismatch vs reference"

    print("KERNEL_OK")
</pallas_src>

<mosaic_0001>
module attributes {stable_mosaic.version = 11 : i64} {
  func.func @_attention_kernel(%arg0: i32, %arg1: memref<1x8x128xf32, #tpu.memory_space<vmem>>, %arg2: memref<8x128xf32, #tpu.memory_space<vmem>>, %arg3: memref<128x128xf32, #tpu.memory_space<vmem>>, %arg4: memref<128x128xf32, #tpu.memory_space<vmem>>, %arg5: memref<128x128xf32, #tpu.memory_space<vmem>>, %arg6: memref<1x128xf32, #tpu.memory_space<vmem>>, %arg7: memref<1x128xf32, #tpu.memory_space<vmem>>, %arg8: memref<1x128xf32, #tpu.memory_space<vmem>>, %arg9: memref<1x8x128xf32, #tpu.memory_space<vmem>>) attributes {dimension_semantics = [#tpu.dimension_semantics<parallel>], iteration_bounds = array<i64: 2>, scalar_prefetch = 0 : i64, scratch_operands = 0 : i64, tpu.core_type = #tpu.core_type<tc>, window_params = [{transform_indices = @transform_0, window_bounds = array<i64: 1, 8, 128>}, {pipeline_mode = #tpu.pipeline_mode<synchronous>, transform_indices = @transform_1, window_bounds = array<i64: 8, 128>}, {pipeline_mode = #tpu.pipeline_mode<synchronous>, transform_indices = @transform_2, window_bounds = array<i64: 128, 128>}, {pipeline_mode = #tpu.pipeline_mode<synchronous>, transform_indices = @transform_3, window_bounds = array<i64: 128, 128>}, {pipeline_mode = #tpu.pipeline_mode<synchronous>, transform_indices = @transform_4, window_bounds = array<i64: 128, 128>}, {pipeline_mode = #tpu.pipeline_mode<synchronous>, transform_indices = @transform_5, window_bounds = array<i64: 1, 128>}, {pipeline_mode = #tpu.pipeline_mode<synchronous>, transform_indices = @transform_6, window_bounds = array<i64: 1, 128>}, {pipeline_mode = #tpu.pipeline_mode<synchronous>, transform_indices = @transform_7, window_bounds = array<i64: 1, 128>}, {transform_indices = @transform_8, window_bounds = array<i64: 1, 8, 128>}]} {
    %c0 = arith.constant 0 : index
    %c0_0 = arith.constant 0 : index
    %c0_1 = arith.constant 0 : index
    %0 = vector.load %arg1[%c0, %c0_0, %c0_1] : memref<1x8x128xf32, #tpu.memory_space<vmem>>, vector<1x8x128xf32>
    %1 = vector.shape_cast %0 : vector<1x8x128xf32> to vector<8x128xf32>
    %c0_2 = arith.constant 0 : index
    %c0_3 = arith.constant 0 : index
    %2 = vector.load %arg2[%c0_2, %c0_3] : memref<8x128xf32, #tpu.memory_space<vmem>>, vector<8x128xf32>
    %3 = arith.addf %1, %2 : vector<8x128xf32>
    %c0_4 = arith.constant 0 : index
    %c0_5 = arith.constant 0 : index
    %4 = vector.load %arg3[%c0_4, %c0_5] : memref<128x128xf32, #tpu.memory_space<vmem>>, vector<128x128xf32>
    %c0_6 = arith.constant 0 : index
    %c0_7 = arith.constant 0 : index
    %5 = vector.load %arg4[%c0_6, %c0_7] : memref<128x128xf32, #tpu.memory_space<vmem>>, vector<128x128xf32>
    %c0_8 = arith.constant 0 : index
    %c0_9 = arith.constant 0 : index
    %6 = vector.load %arg5[%c0_8, %c0_9] : memref<128x128xf32, #tpu.memory_space<vmem>>, vector<128x128xf32>
    %cst = arith.constant dense<0.000000e+00> : vector<8x128xf32>
    %7 = tpu.matmul %3, %4, %cst {dimension_numbers = #tpu.dot_dimension_numbers<[1], [0], [0], [1], [0, 0, 1, 1], [], []>} : vector<8x128xf32>, vector<128x128xf32>, vector<8x128xf32> -> vector<8x128xf32>
    %c0_10 = arith.constant 0 : index
    %c0_11 = arith.constant 0 : index
    %8 = vector.load %arg6[%c0_10, %c0_11] : memref<1x128xf32, #tpu.memory_space<vmem>>, vector<1x128xf32>
    %9 = vector.broadcast %8 : vector<1x128xf32> to vector<8x128xf32>
    %10 = arith.addf %7, %9 : vector<8x128xf32>
    %cst_12 = arith.constant dense<0.000000e+00> : vector<8x128xf32>
    %11 = tpu.matmul %3, %5, %cst_12 {dimension_numbers = #tpu.dot_dimension_numbers<[1], [0], [0], [1], [0, 0, 1, 1], [], []>} : vector<8x128xf32>, vector<128x128xf32>, vector<8x128xf32> -> vector<8x128xf32>
    %c0_13 = arith.constant 0 : index
    %c0_14 = arith.constant 0 : index
    %12 = vector.load %arg7[%c0_13, %c0_14] : memref<1x128xf32, #tpu.memory_space<vmem>>, vector<1x128xf32>
    %13 = vector.broadcast %12 : vector<1x128xf32> to vector<8x128xf32>
    %14 = arith.addf %11, %13 : vector<8x128xf32>
    %cst_15 = arith.constant dense<0.000000e+00> : vector<8x128xf32>
    %15 = tpu.matmul %3, %6, %cst_15 {dimension_numbers = #tpu.dot_dimension_numbers<[1], [0], [0], [1], [0, 0, 1, 1], [], []>} : vector<8x128xf32>, vector<128x128xf32>, vector<8x128xf32> -> vector<8x128xf32>
    %c0_16 = arith.constant 0 : index
    %c0_17 = arith.constant 0 : index
    %16 = vector.load %arg8[%c0_16, %c0_17] : memref<1x128xf32, #tpu.memory_space<vmem>>, vector<1x128xf32>
    %17 = vector.broadcast %16 : vector<1x128xf32> to vector<8x128xf32>
    %18 = arith.addf %15, %17 : vector<8x128xf32>
    %19 = tpu.transpose %14, [1, 0] : vector<8x128xf32> -> vector<128x8xf32>
    %cst_18 = arith.constant dense<0.000000e+00> : vector<8x8xf32>
    %20 = tpu.matmul %10, %19, %cst_18 {dimension_numbers = #tpu.dot_dimension_numbers<[1], [0], [0], [1], [0, 0, 1, 1], [], []>} : vector<8x128xf32>, vector<128x8xf32>, vector<8x8xf32> -> vector<8x8xf32>
    %cst_19 = arith.constant 0.0883883461 : f32
    %21 = vector.broadcast %cst_19 : f32 to vector<8x8xf32>
    %22 = arith.mulf %20, %21 : vector<8x8xf32>
    %cst_20 = arith.constant dense<0xFF800000> : vector<8xf32>
    %23 = vector.multi_reduction <maximumf>, %22, %cst_20 [1] : vector<8x8xf32> to vector<8xf32>
    %24 = vector.shape_cast %23 : vector<8xf32> to vector<8x1xf32>
    %25 = vector.broadcast %24 : vector<8x1xf32> to vector<8x8xf32>
    %26 = arith.subf %22, %25 : vector<8x8xf32>
    %27 = math.exp %26 : vector<8x8xf32>
    %cst_21 = arith.constant dense<0.000000e+00> : vector<8xf32>
    %28 = vector.multi_reduction <add>, %27, %cst_21 [1] : vector<8x8xf32> to vector<8xf32>
    %29 = vector.shape_cast %28 : vector<8xf32> to vector<8x1xf32>
    %30 = tpu.reciprocal %29 : vector<8x1xf32> -> vector<8x1xf32>
    %31 = vector.broadcast %30 : vector<8x1xf32> to vector<8x8xf32>
    %32 = arith.mulf %27, %31 : vector<8x8xf32>
    %cst_22 = arith.constant dense<0.000000e+00> : vector<8x128xf32>
    %33 = tpu.matmul %32, %18, %cst_22 {dimension_numbers = #tpu.dot_dimension_numbers<[1], [0], [0], [1], [0, 0, 1, 1], [], []>} : vector<8x8xf32>, vector<8x128xf32>, vector<8x128xf32> -> vector<8x128xf32>
    %c0_23 = arith.constant 0 : index
    %c0_24 = arith.constant 0 : index
    %c0_25 = arith.constant 0 : index
    %34 = vector.load %arg9[%c0_23, %c0_24, %c0_25] : memref<1x8x128xf32, #tpu.memory_space<vmem>>, vector<1x8x128xf32>
    %35 = vector.shape_cast %34 : vector<1x8x128xf32> to vector<8x128xf32>
    %36 = vector.shape_cast %33 : vector<8x128xf32> to vector<1x8x128xf32>
    tpu.vector_store %arg9[%c0_23, %c0_24, %c0_25], %36 {strides = array<i32>} : memref<1x8x128xf32, #tpu.memory_space<vmem>>, vector<1x8x128xf32>,
    return
  }
  func.func @transform_0(%arg0: i32) -> (i32, i32, i32) {
    %c0_i32 = arith.constant 0 : i32
    %c0_i32_0 = arith.constant 0 : i32
    %c0_i32_1 = arith.constant 0 : i32
    return %arg0, %c0_i32, %c0_i32_0 : i32, i32, i32
  }
  func.func @transform_1(%arg0: i32) -> (i32, i32) {
    %c0_i32 = arith.constant 0 : i32
    %c0_i32_0 = arith.constant 0 : i32
    %c0_i32_1 = arith.constant 0 : i32
    return %c0_i32, %c0_i32_0 : i32, i32
  }
  func.func @transform_2(%arg0: i32) -> (i32, i32) {
    %c0_i32 = arith.constant 0 : i32
    %c0_i32_0 = arith.constant 0 : i32
    %c0_i32_1 = arith.constant 0 : i32
    return %c0_i32, %c0_i32_0 : i32, i32
  }
  func.func @transform_3(%arg0: i32) -> (i32, i32) {
    %c0_i32 = arith.constant 0 : i32
    %c0_i32_0 = arith.constant 0 : i32
    %c0_i32_1 = arith.constant 0 : i32
    return %c0_i32, %c0_i32_0 : i32, i32
  }
  func.func @transform_4(%arg0: i32) -> (i32, i32) {
    %c0_i32 = arith.constant 0 : i32
    %c0_i32_0 = arith.constant 0 : i32
    %c0_i32_1 = arith.constant 0 : i32
    return %c0_i32, %c0_i32_0 : i32, i32
  }
  func.func @transform_5(%arg0: i32) -> (i32, i32) {
    %c0_i32 = arith.constant 0 : i32
    %c0_i32_0 = arith.constant 0 : i32
    %c0_i32_1 = arith.constant 0 : i32
    return %c0_i32, %c0_i32_0 : i32, i32
  }
  func.func @transform_6(%arg0: i32) -> (i32, i32) {
    %c0_i32 = arith.constant 0 : i32
    %c0_i32_0 = arith.constant 0 : i32
    %c0_i32_1 = arith.constant 0 : i32
    return %c0_i32, %c0_i32_0 : i32, i32
  }
  func.func @transform_7(%arg0: i32) -> (i32, i32) {
    %c0_i32 = arith.constant 0 : i32
    %c0_i32_0 = arith.constant 0 : i32
    %c0_i32_1 = arith.constant 0 : i32
    return %c0_i32, %c0_i32_0 : i32, i32
  }
  func.func @transform_8(%arg0: i32) -> (i32, i32, i32) {
    %c0_i32 = arith.constant 0 : i32
    %c0_i32_0 = arith.constant 0 : i32
    %c0_i32_1 = arith.constant 0 : i32
    return %arg0, %c0_i32, %c0_i32_0 : i32, i32, i32
  }
}

</mosaic_0001>

<bundles_post_ra>
// kernel: tpu_custom_call.1
= control target key start
LH: loop header
LB: loop body
LE: loop exit
PB: predicated region body
PF: predicated region fallthrough
CT: control target
= control target key end

     0   :  { %s1911_s0 = inlined_call_operand.hbm [shape: f32[2,8,128], index: 0, kind: input, shape index: {}]   ;;  %s1912_s1 = inlined_call_operand.hbm [shape: f32[8,128], index: 1, kind: input, shape index: {}]   ;;  %s1913_s2 = inlined_call_operand.hbm [shape: f32[128,128], index: 2, kind: input, shape index: {}]   ;;  %s1914_s3 = inlined_call_operand.hbm [shape: f32[128,128], index: 3, kind: input, shape index: {}]   ;;  %s1915_s4 = inlined_call_operand.hbm [shape: f32[128,128], index: 4, kind: input, shape index: {}]   ;;  %s1916_s5 = inlined_call_operand.vmem [shape: f32[1,128], index: 5, kind: input, shape index: {}]   ;;  %s1917_s6 = inlined_call_operand.vmem [shape: f32[1,128], index: 6, kind: input, shape index: {}]   ;;  %s1918_s7 = inlined_call_operand.vmem [shape: f32[1,128], index: 7, kind: input, shape index: {}]   ;;  %s1919_s8 = inlined_call_operand.hbm [shape: f32[2,8,128], index: 8, kind: output, shape index: {}]  }
   0x1   :  { %1923 = sst [smem:[#allocation16_spill]] %s1912_s1 }
   0x2   :  { %13 = vsyncpa [#allocation3], 0 }
   0x3   :  { %15 = vsyncpa [#allocation3 + $0x1], 0 }
   0x4   :  { %16 = vsyncpa [#allocation6], 0 }
   0x5   :  { %17 = vsyncpa [#allocation9], 0 }
   0x6   :  { %18 = vsyncpa [#allocation4], 0 }
   0x7   :  { %20 = vsyncpa [#allocation4 + $0x1], 0  ;;  %s1574_s27 = smov 0   ;;  %s1576_s28 = smov 0  }
   0x8   :  { %s1578_s29 = smov 0   ;;  %s1580_s30 = smov 0  }
   0x9 LB: > { %s1518_s9 = smov [#allocation5]   ;;  %s1595_s11 = sadd.s32 4294967295, %s1516_s30   ;;  %s1516_s30 = sphi %s1580_s30, %s1945_s30   ;;  %s1512_s29 = sphi %s1578_s29, %s1944_s29   ;;  %s1508_s28 = sphi %s1576_s28, %s1943_s28   ;;  %s1504_s27 = sphi %s1574_s27, %s1942_s27  }
   0xa   : > { %s243_s10 = sshll.u32 %s1518_s9, 4  ;;  %p939_p0 = scmp.ge.s32.totalorder %s1516_s30, 1  ;;  %s244_s10 = int_to_ptr.vmem [resolvable:$true] %s243_s10 }
   0xb   : > { %p1920_p1 = scmp.eq.s32.totalorder %s1595_s11, 0  ;;  %p230_p2 = scmp.lt.s32.totalorder %s1516_s30, 3 }
   0xc   : > { %s1519_s13 = smov [#allocation8]   ;;  %s1520_s16 = smov [#allocation7]  }
   0xd   : > { %p1600_p3 = pnand %p939_p0, %p230_p2  ;;  %s266_s14 = sshll.u32 %s1519_s13, 4  ;;  %s1613_s14 = int_to_ptr.vmem [resolvable:$true] %s266_s14 }
   0xe   : > { %s253_s17 = sshll.u32 %s1520_s16, 4  ;;  %s1926_s1 = sld [smem:[#allocation16_spill]]  ;;  %s1615_s17 = int_to_ptr.vmem [resolvable:$true] %s253_s17 }
   0xf   : > { %s1924_s12 = scalar_select %p1600_p3, 1, 0 }
  0x10   : > { %p1224_p5 = pneg %p1600_p3 }
  0x12   : > { %p1609_p6 = pnand %p1224_p5, %p1920_p1 }
  0x14   : > { %s1300_s20 = scalar_lea.hbm %s1926_s1, 128  ;;  %p1625_p8 = pneg %p1609_p6 }
  0x15   : > { %p1301_p7 = scmp.ne.s32.totalorder %s1926_s1, %s1300_s20  ;;  %p1307_p11 = scmp.lt.u32.totalorder %s1300_s20, %s1926_s1 }
  0x17   : > { %p1303_p9 = pnand %p1625_p8, %p1301_p7 }
  0x19   : > { %p1304_p10 = pneg %p1303_p9 }
  0x1b   : > { %p1309_p12 = pnand %p1307_p11, %p1304_p10 }
  0x1d   : > { %1312 = shalt.err (!%p1309_p12)
}
  0x1e   : > { %s1313_s26 = scalar_lea.vmem %s244_s10, 128  ;;  %p1321_p5 = scmp.lt.s32.totalorder %s244_s10, %s244_s10 }
  0x1f   : > { %p1314_p13 = scmp.ne.s32.totalorder %s244_s10, %s1313_s26  ;;  %p1322_p4 = scmp.lt.s32.totalorder %s1313_s26, %s1313_s26 }
  0x21   : > { %p1316_p0 = pnand %p1314_p13, %p1625_p8  ;;  %p1323_p1 = por %p1322_p4, %p1321_p5 }
  0x23   : > { %p1317_p2 = pneg %p1316_p0 }
  0x25   : > { %p1324_p3 = pnand %p1323_p1, %p1317_p2 }
  0x27   : > { %1327 = shalt.err (!%p1324_p3)
}
  0x28   : > { %1227 = dma.hbm_to_vmem [thread:$0]  (!%p1609_p6), %s1926_s1, 128, %s244_s10, [#allocation6]  }
  0x29   : > { %s1328_s19 = scalar_lea.hbm %s1914_s3, 2048 }
  0x2a   : > { %p1329_p7 = scmp.ne.s32.totalorder %s1914_s3, %s1328_s19  ;;  %p1335_p1 = scmp.lt.u32.totalorder %s1328_s19, %s1914_s3 }
  0x2c   : > { %p1331_p9 = pnand %p1329_p7, %p1625_p8 }
  0x2e   : > { %p1332_p4 = pneg %p1331_p9 }
  0x30   : > { %p1337_p3 = pnand %p1335_p1, %p1332_p4 }
  0x32   : > { %1340 = shalt.err (!%p1337_p3)
}
  0x33   : > { %s1341_s10 = scalar_lea.vmem %s1613_s14, 2048  ;;  %p1349_p13 = scmp.lt.s32.totalorder %s1613_s14, %s1613_s14 }
  0x34   : > { %p1342_p10 = scmp.ne.s32.totalorder %s1613_s14, %s1341_s10  ;;  %p1350_p0 = scmp.lt.s32.totalorder %s1341_s10, %s1341_s10 }
  0x36   : > { %p1344_p11 = pnand %p1342_p10, %p1625_p8  ;;  %p1351_p2 = por %p1350_p0, %p1349_p13 }
  0x38   : > { %p1345_p12 = pneg %p1344_p11 }
  0x3a   : > { %p1352_p5 = pnand %p1351_p2, %p1345_p12 }
  0x3c   : > { %1355 = shalt.err (!%p1352_p5)
}
  0x3d   : > { %s1521_s25 = smov 128   ;;  %s1522_s26 = smov 8  }
  0x3e   : > { %1233 = dma.hbm_to_vmem [thread:$0]  (!%p1609_p6), %s1914_s3, 2048, %s1613_s14, [#allocation9], %s1521_s25, %s1521_s25, %s1522_s26  }
  0x3f   : > { %s1356_s19 = scalar_lea.hbm %s1913_s2, 2048 }
  0x40   : > { %p1357_p7 = scmp.ne.s32.totalorder %s1913_s2, %s1356_s19  ;;  %p1363_p1 = scmp.lt.u32.totalorder %s1356_s19, %s1913_s2 }
  0x42   : > { %p1359_p9 = pnand %p1357_p7, %p1625_p8 }
  0x44   : > { %p1360_p4 = pneg %p1359_p9 }
  0x46   : > { %p1365_p3 = pnand %p1363_p1, %p1360_p4 }
  0x48   : > { %1368 = shalt.err (!%p1365_p3)
}
  0x49   : > { %s1369_s14 = scalar_lea.vmem %s1615_s17, 2048  ;;  %p1377_p13 = scmp.lt.s32.totalorder %s1615_s17, %s1615_s17 }
  0x4a   : > { %p1370_p10 = scmp.ne.s32.totalorder %s1615_s17, %s1369_s14  ;;  %p1378_p0 = scmp.lt.s32.totalorder %s1369_s14, %s1369_s14 }
  0x4c   : > { %p1372_p11 = pnand %p1370_p10, %p1625_p8  ;;  %p1379_p2 = por %p1378_p0, %p1377_p13 }
  0x4e   : > { %p1373_p12 = pneg %p1372_p11 }
  0x50   : > { %p1380_p5 = pnand %p1379_p2, %p1373_p12 }
  0x52   : > { %1383 = shalt.err (!%p1380_p5)
}
  0x53   : > { %1230 = dma.hbm_to_vmem [thread:$0]  (!%p1609_p6), %s1913_s2, 2048, %s1615_s17, [#allocation6], %s1521_s25, %s1521_s25, %s1522_s26  }
  0x54   : > { %s1523_s13 = smov [#allocation10]   ;;  %s1384_s20 = scalar_lea.hbm %s1915_s4, 2048 }
  0x55   : > { %s279_s16 = sshll.u32 %s1523_s13, 4  ;;  %p1385_p7 = scmp.ne.s32.totalorder %s1915_s4, %s1384_s20  ;;  %s280_s16 = int_to_ptr.vmem [resolvable:$true] %s279_s16 }
  0x56   : > { %p1391_p1 = scmp.lt.u32.totalorder %s1384_s20, %s1915_s4 }
  0x57   : > { %p1387_p9 = pnand %p1385_p7, %p1625_p8 }
  0x59   : > { %p1388_p4 = pneg %p1387_p9 }
  0x5b   : > { %p1393_p3 = pnand %p1391_p1, %p1388_p4 }
  0x5d   : > { %1396 = shalt.err (!%p1393_p3)
}
  0x5e   : > { %s1397_s17 = scalar_lea.vmem %s280_s16, 2048  ;;  %p1405_p13 = scmp.lt.s32.totalorder %s280_s16, %s280_s16 }
  0x5f   : > { %p1398_p10 = scmp.ne.s32.totalorder %s280_s16, %s1397_s17  ;;  %p1406_p0 = scmp.lt.s32.totalorder %s1397_s17, %s1397_s17 }
  0x61   : > { %p1400_p11 = pnand %p1398_p10, %p1625_p8  ;;  %p1407_p2 = por %p1406_p0, %p1405_p13 }
  0x63   : > { %p1401_p12 = pneg %p1400_p11 }
  0x65   : > { %p1408_p5 = pnand %p1407_p2, %p1401_p12 }
  0x67   : > { %1411 = shalt.err (!%p1408_p5)
}
  0x68   : > { %1236 = dma.hbm_to_vmem [thread:$0]  (!%p1609_p6), %s1915_s4, 2048, %s280_s16, [#allocation9], %s1521_s25, %s1521_s25, %s1522_s26  }
  0x69   : > { %s938_s15 = sadd.s32 4294967294, %s1516_s30   ;;  %s1716_s23 = sadd.s32 1, %s1516_s30  }
  0x6a   : > { %s30_s13 = ssub.s32 %s1516_s30, %s1716_s23  ;;  %s33_s18 = sadd.s32 1, %s1512_s29 }
  0x6b   : > { %p31_p8 = scmp.eq.s32.totalorder %s30_s13, 0  ;;  %p40_p7 = scmp.ne.s32.totalorder %s1512_s29, %s1508_s28 }
  0x6c   : > { %p41_p9 = scmp.eq.s32.totalorder %s1516_s30, 0  ;;  %p46_p4 = scmp.ne.s32.totalorder %s1508_s28, %s1504_s27 }
  0x6d   : > { %s1727_s19 = scalar_select %p31_p8, %s1512_s29, %s33_s18  }
  0x6e   : > { %p1729_p1 = por %p41_p9, %p40_p7  ;;  %p1929_p3 = scmp.eq.s32.totalorder %s1595_s11, 0 }
  0x6f   : > { %p217_p10 = scmp.eq.s32.totalorder %s1595_s11, 1  ;;  %p223_p11 = scmp.eq.s32.totalorder %s938_s15, 1 }
  0x70   : > { %p1735_p6 = por %p1929_p3, %p46_p4  ;;  %p1249_p12 = scmp.lt.s32.totalorder %s1516_s30, 2 }
  0x71   : > { %s302_s26 = sand.u32 1, %s1512_s29   ;;  %p1742_p13 = por %p217_p10, %p40_p7 }
  0x72   : > { %p1746_p0 = por %p223_p11, %p46_p4  ;;  %s945_s22 = sshll.u32 %s302_s26, 3 }
  0x73   : > { %s1931_s16 = scalar_select %p1742_p13, 1, 0 }
  0x74   : > { %s1932_s21 = scalar_select %p1746_p0, 1, 0 }
  0x75   : > { %s946_s24 = sshll.u32 %s1516_s30, 7  ;;  %s306_s9 = scalar_lea.vmem [#allocation2], %s945_s22 }
  0x76   : > { %s1754_s10 = scalar_lea.hbm %s1911_s0, %s946_s24  ;;  %s313_s15 = sshll.u32 %s306_s9, 4  ;;  %s1756_s15 = int_to_ptr.vmem [resolvable:$true] %s313_s15 }
  0x77   : > { %p1760_p2 = pnand %p1249_p12, %p1729_p1  ;;  %s303_s18 = scalar_lea.sflag [#allocation3], %s302_s26 }
  0x78   : > { %s1412_s1 = scalar_lea.hbm %s1754_s10, 128  ;;  %s1417_s14 = scalar_lea.hbm %s1911_s0, 256 }
  0x79   : > { %p1413_p5 = scmp.ne.s32.totalorder %s1754_s10, %s1412_s1  ;;  %p1414_p8 = pneg %p1760_p2 }
  0x7a   : > { %p1418_p4 = scmp.lt.u32.totalorder %s1754_s10, %s1911_s0  ;;  %p1419_p1 = scmp.lt.u32.totalorder %s1417_s14, %s1412_s1 }
  0x7b   : > { %p1415_p7 = pnand %p1414_p8, %p1413_p5  ;;  %p1421_p10 = scmp.lt.u32.totalorder %s1412_s1, %s1754_s10 }
  0x7c   : > { %p1420_p3 = por %p1419_p1, %p1418_p4 }
  0x7d   : > { %p1416_p9 = pneg %p1415_p7 }
  0x7e   : > { %p1422_p11 = por %p1421_p10, %p1420_p3 }
  0x80   : > { %p1423_p12 = pnand %p1422_p11, %p1416_p9 }
  0x82   : > { %1426 = shalt.err (!%p1423_p12)
}
  0x83   : > { %s1427_s26 = scalar_lea.vmem %s1756_s15, 128  ;;  %s1524_s9 = smov [#allocation2]  }
  0x84   : > { %p1428_p5 = scmp.ne.s32.totalorder %s1756_s15, %s1427_s26  ;;  %s1432_s22 = sshll.u32 %s1524_s9, 4  ;;  %s1433_s22 = int_to_ptr.vmem [resolvable:$false] %s1432_s22 }
  0x85   : > { %s1434_s24 = scalar_lea.vmem %s1433_s22, 256  ;;  %p1435_p13 = scmp.lt.s32.totalorder %s1756_s15, %s1433_s22 }
  0x86   : > { %p1430_p7 = pnand %p1428_p5, %p1414_p8  ;;  %p1436_p4 = scmp.lt.s32.totalorder %s1434_s24, %s1427_s26 }
  0x88   : > { %p1431_p0 = pneg %p1430_p7  ;;  %p1437_p1 = por %p1436_p4, %p1435_p13 }
  0x8a   : > { %p1438_p3 = pnand %p1437_p1, %p1431_p0 }
  0x8c   : > { %1441 = shalt.err (!%p1438_p3)
}
  0x8d   : > { %1240 = dma.hbm_to_vmem [thread:$0]  (!%p1760_p2), %s1754_s10, 128, %s1756_s15, %s303_s18  }
  0x8e   : > { %p1934_p9 = scmp.ne.s32.totalorder %s1924_s12, 0 }
  0x8f   : > { %s1792_s1 = sand.u32 (!%p1934_p9), 1, %s1508_s28  }
  0x90   : > { %322 = sbr.rel (%p1934_p9) target bundleno = 1165 (0x48d), region = 52  ;;  %s948_s14 = sshll.u32 (!%p1934_p9), %s1792_s1, 3 }
  0x91   : > { %s325_s20 = scalar_lea.sflag (!%p1934_p9), [#allocation3], %s1792_s1  ;;  %s1798_s17 = scalar_lea.vmem (!%p1934_p9), [#allocation2], %s948_s14 }
  0x97   : > { %1487 = dma.done.wait (%p1735_p6), %s325_s20, 128  }
  0x98   : > { %1489 = vsyncadd (%p1735_p6), %s325_s20, 4294967168  ;;  %p1935_p13 = scmp.eq.s32.totalorder %s1595_s11, 0 }
  0x9a   : > { %1491 = dma.done.wait (%p1935_p13), [#allocation6], 2176   ;;  %p1936_p0 = pmov %p1935_p13 }
  0x9c   : > { %1493 = vsyncadd (%p1936_p0), [#allocation6], 4294965120  ;;  %p1937_p2 = pmov %p1936_p0 }
  0x9d   : > { %p1938_p8 = pmov %p1936_p0 }
  0x9e   : > { %1495 = dma.done.wait (%p1937_p2), [#allocation9], 4096  }
  0x9f   : > { %1497 = vsyncadd (%p1938_p8), [#allocation9], 4294963200  ;;  %v1525_v0 = vmov 0.0|0.0   ;;  %vm1526_vm0 = vmmov 0   ;;  %v1527_v1 = vmov 0.0   ;;  %v396_v2 = vld [vmem:[#allocation8] sm:$0xff] }
  0xa0   : > { %1156 = vmatprep.subr.bf16.mxu1 %v1525_v0  ;;  %1132 = vmatprep.subr.bf16.mxu0 %v1525_v0  ;;  %v397_v3 = vld [vmem:[#allocation8 + $0x8] sm:$0xff]  ;;  %v380_v4 = vld [vmem:[#allocation7] sm:$0xff]  ;;  %v398_v7 = vld [vmem:[#allocation8 + $0x10] sm:$0xff]  ;;  %vm730_vm1 = vcmask 64512   ;;  %s376_s26 = scalar_lea.vmem [#allocation11], %s948_s14  ;;  %s959_s22 = sshll.u32 %s1595_s11, 7 }
  0xa1   : > { %1084 = vmatprep.mubr.msk.f32.mxu1 %vm1526_vm0, %v1527_v1  ;;  %1049 = vmatprep.mubr.msk.f32.mxu0 %vm1526_vm0, %v1527_v1  ;;  %v1157_v5 = vpack.c.bf16 %v397_v3, %v396_v2  ;;  %v381_v6 = vld [vmem:[#allocation7 + $0x8] sm:$0xff]  ;;  %v399_v8 = vld [vmem:[#allocation8 + $0x18] sm:$0xff]  ;;  %v382_v10 = vld [vmem:[#allocation7 + $0x10] sm:$0xff]  ;;  %s830_s9 = sshll.u32 %s376_s26, 4  ;;  %s817_s12 = scalar_lea.sflag [#allocation4], %s1792_s1  ;;  %s1864_s9 = int_to_ptr.vmem [resolvable:$true] %s830_s9 }
  0xa2   : > { %v1133_v9 = vpack.c.bf16 %v381_v6, %v380_v4  ;;  %v383_v11 = vld [vmem:[#allocation7 + $0x18] sm:$0xff]  ;;  %v1160_v12 = vpack.c.bf16 %v399_v8, %v398_v7  ;;  %v400_v14 = vld [vmem:[#allocation8 + $0x20] sm:$0xff]  ;;  %v401_v15 = vld [vmem:[#allocation8 + $0x28] sm:$0xff]  ;;  %s1442_s25 = scalar_lea.vmem %s1864_s9, 128  ;;  %p1939_p10 = scmp.ne.s32.totalorder %s1931_s16, 0 }
  0xa3   : > { %1158 = vmatpush3.bf16.msra.mxu1 %v1157_v5  ;;  %v1136_v13 = vpack.c.bf16 %v383_v11, %v382_v10  ;;  %v384_v16 = vld [vmem:[#allocation7 + $0x20] sm:$0xff]  ;;  %v385_v17 = vld [vmem:[#allocation7 + $0x28] sm:$0xff]  ;;  %v1163_v18 = vpack.c.bf16 %v401_v15, %v400_v14  ;;  %v402_v20 = vld [vmem:[#allocation8 + $0x30] sm:$0xff]  ;;  %p1443_p6 = scmp.ne.s32.totalorder %s1864_s9, %s1442_s25  ;;  %s1528_s11 = smov [#allocation11]  }
  0xa4   : > { %1134 = vmatpush3.bf16.msra.mxu0 %v1133_v9  ;;  %1159 = vmatprep.subr.bf16.mxu1 %v1525_v0  ;;  %v1139_v19 = vpack.c.bf16 %v385_v17, %v384_v16  ;;  %v403_v21 = vld [vmem:[#allocation8 + $0x38] sm:$0xff]  ;;  %v386_v22 = vld [vmem:[#allocation7 + $0x30] sm:$0xff]  ;;  %v404_v26 = vld [vmem:[#allocation8 + $0x40] sm:$0xff]  ;;  %s1446_s14 = sshll.u32 %s1528_s11, 4  ;;  %s1447_s14 = int_to_ptr.vmem [resolvable:$false] %s1446_s14 }
  0xa5   : > { %1135 = vmatprep.subr.bf16.mxu0 %v1525_v0  ;;  %v387_v23 = vld [vmem:[#allocation7 + $0x38] sm:$0xff]  ;;  %v1166_v24 = vpack.c.bf16 %v403_v21, %v402_v20  ;;  %v405_v27 = vld [vmem:[#allocation8 + $0x48] sm:$0xff]  ;;  %v388_v28 = vld [vmem:[#allocation7 + $0x40] sm:$0xff]  ;;  %p1444_p11 = pnand %p1443_p6, %p1939_p10  ;;  %s1448_s10 = scalar_lea.vmem %s1447_s14, 256 }
  0xa6   : > { %v1142_v25 = vpack.c.bf16 %v387_v23, %v386_v22  ;;  %v389_v29 = vld [vmem:[#allocation7 + $0x48] sm:$0xff]  ;;  %v1169_v30 = vpack.c.bf16 %v405_v27, %v404_v26  ;;  %v406_v32 = vld [vmem:[#allocation8 + $0x50] sm:$0xff]  ;;  %v407_v33 = vld [vmem:[#allocation8 + $0x58] sm:$0xff]  ;;  %p1449_p5 = scmp.lt.s32.totalorder %s1864_s9, %s1447_s14  ;;  %p1450_p7 = scmp.lt.s32.totalorder %s1448_s10, %s1442_s25 }
  0xa7   : > { %1161 = vmatpush3.bf16.msra.mxu1 %v1160_v12  ;;  %v1145_v31 = vpack.c.bf16 %v389_v29, %v388_v28  ;;  %v390_v34 = vld [vmem:[#allocation7 + $0x50] sm:$0xff]  ;;  %v391_v35 = vld [vmem:[#allocation7 + $0x58] sm:$0xff]  ;;  %v1172_v36 = vpack.c.bf16 %v407_v33, %v406_v32  ;;  %v408_v38 = vld [vmem:[#allocation8 + $0x60] sm:$0xff]  ;;  %p1445_p12 = pneg %p1444_p11 }
  0xa8   : > { %1137 = vmatpush3.bf16.msra.mxu0 %v1136_v13  ;;  %1162 = vmatprep.subr.bf16.mxu1 %v1525_v0  ;;  %v1148_v37 = vpack.c.bf16 %v391_v35, %v390_v34  ;;  %v409_v39 = vld [vmem:[#allocation8 + $0x68] sm:$0xff]  ;;  %v392_v40 = vld [vmem:[#allocation7 + $0x60] sm:$0xff]  ;;  %v410_v44 = vld [vmem:[#allocation8 + $0x70] sm:$0xff]  ;;  %p1451_p4 = por %p1450_p7, %p1449_p5 }
  0xa9   : > { %1138 = vmatprep.subr.bf16.mxu0 %v1525_v0  ;;  %v393_v41 = vld [vmem:[#allocation7 + $0x68] sm:$0xff]  ;;  %v1175_v42 = vpack.c.bf16 %v409_v39, %v408_v38  ;;  %v411_v45 = vld [vmem:[#allocation8 + $0x78] sm:$0xff]  ;;  %v394_v46 = vld [vmem:[#allocation7 + $0x70] sm:$0xff] }
  0xaa   : > { %v1151_v43 = vpack.c.bf16 %v393_v41, %v392_v40  ;;  %v395_v47 = vld [vmem:[#allocation7 + $0x78] sm:$0xff]  ;;  %v1178_v48 = vpack.c.bf16 %v411_v45, %v410_v44  ;;  %v377_v49 = vld [vmem:[%s1798_s17] sm:$0xff]  ;;  %v412_v61 = vld [vmem:[#allocation10] sm:$0xff]  ;;  %s1869_s17 = scalar_lea.hbm %s1919_s8, %s959_s22  ;;  %p1452_p1 = pnand %p1451_p4, %p1445_p12 }
  0xab   : > { %1164 = vmatpush3.bf16.msra.mxu1 %v1163_v18  ;;  %v378_v50 = vld [vmem:[#allocation5] sm:$0xff]  ;;  %v1154_v51 = vpack.c.bf16 %v395_v47, %v394_v46  ;;  %v955_v53 = vld [vmem:[%s1917_s6] ss:$0 sm:$0xff]  ;;  %v414_v63 = vld [vmem:[#allocation10 + $0x10] sm:$0xff] }
  0xac   : > { %1140 = vmatpush3.bf16.msra.mxu0 %v1139_v19  ;;  %1165 = vmatprep.subr.bf16.mxu1 %v1525_v0  ;;  %v379_v52 = vadd.f32 %v378_v50, %v377_v49  ;;  %v954_v54 = vld [vmem:[%s1916_s5] ss:$0 sm:$0xff]  ;;  %v415_v3 = vld [vmem:[#allocation10 + $0x18] sm:$0xff]  ;;  %v416_v5 = vld [vmem:[#allocation10 + $0x20] sm:$0xff] }
  0xad   : > { %1141 = vmatprep.subr.bf16.mxu0 %v1525_v0  ;;  %v413_v62 = vld [vmem:[#allocation10 + $0x8] sm:$0xff]  ;;  %v1184_v4 = vpack.c.bf16 %v415_v3, %v414_v63  ;;  %v418_v8 = vld [vmem:[#allocation10 + $0x30] sm:$0xff]  ;;  %v419_v9 = vld [vmem:[#allocation10 + $0x38] sm:$0xff] }
  0xae   : > { %v1181_v2 = vpack.c.bf16 %v413_v62, %v412_v61  ;;  %v417_v6 = vld [vmem:[#allocation10 + $0x28] sm:$0xff]  ;;  %v1190_v10 = vpack.c.bf16 %v419_v9, %v418_v8  ;;  %v422_v13 = vld [vmem:[#allocation10 + $0x50] sm:$0xff]  ;;  %v423_v14 = vld [vmem:[#allocation10 + $0x58] sm:$0xff] }
  0xaf   : > { %1167 = vmatpush3.bf16.msra.mxu1 %v1166_v24  ;;  %v1187_v7 = vpack.c.bf16 %v417_v6, %v416_v5  ;;  %v421_v11 = vld [vmem:[#allocation10 + $0x48] sm:$0xff]  ;;  %v1196_v15 = vpack.c.bf16 %v423_v14, %v422_v13  ;;  %v424_v16 = vld [vmem:[#allocation10 + $0x60] sm:$0xff]  ;;  %v426_v19 = vld [vmem:[#allocation10 + $0x70] sm:$0xff] }
  0xb0   : > { %1143 = vmatpush3.bf16.msra.mxu0 %v1142_v25  ;;  %1168 = vmatprep.subr.bf16.mxu1 %v1525_v0  ;;  %v425_v17 = vld [vmem:[#allocation10 + $0x68] sm:$0xff]  ;;  %v427_v20 = vld [vmem:[#allocation10 + $0x78] sm:$0xff] }
  0xb1   : > { %1144 = vmatprep.subr.bf16.mxu0 %v1525_v0  ;;  %v1199_v18 = vpack.c.bf16 %v425_v17, %v424_v16  ;;  %v1202_v21 = vpack.c.bf16 %v427_v20, %v426_v19 }
  0xb3   : > { %1170 = vmatpush3.bf16.msra.mxu1 %v1169_v30 }
  0xb4   : > { %1146 = vmatpush3.bf16.msra.mxu0 %v1145_v31  ;;  %1171 = vmatprep.subr.bf16.mxu1 %v1525_v0  ;;  %v956_v31 = vld [vmem:[%s1918_s7] ss:$0 sm:$0xff] }
  0xb5   : > { %1147 = vmatprep.subr.bf16.mxu0 %v1525_v0 }
  0xb7   : > { %1173 = vmatpush3.bf16.msra.mxu1 %v1172_v36 }
  0xb8   : > { %1149 = vmatpush3.bf16.msra.mxu0 %v1148_v37  ;;  %1174 = vmatprep.subr.bf16.mxu1 %v1525_v0 }
  0xb9   : > { %1150 = vmatprep.subr.bf16.mxu0 %v1525_v0 }
  0xbb   : > { %1176 = vmatpush3.bf16.msra.mxu1 %v1175_v42 }
  0xbc   : > { %1152 = vmatpush3.bf16.msra.mxu0 %v1151_v43  ;;  %1177 = vmatprep.subr.bf16.mxu1 %v1525_v0 }
  0xbd   : > { %1153 = vmatprep.subr.bf16.mxu0 %v1525_v0 }
  0xbf   : > { %1179 = vmatpush3.bf16.msra.mxu1 %v1178_v48 }
  0xc0   : > { %1155 = vmatpush3.bf16.msra.mxu0 %v1154_v51  ;;  %1122 = vmatprep.subr.mxu1 %v1527_v1 }
  0xc1   : > { %1180 = vmatprep.subr.bf16.mxu0 %v1525_v0 }
  0xc2   : > { %1085 = vmatmul.mubr.f32.vlgmr.msra.gmra.mrb[0].mxu1 %v379_v52 }
  0xc3   : > { %1050 = vmatmul.mubr.f32.vlgmr.msra.gmra.mrb[0].mxu0 %v379_v52  ;;  %1124 = vmatprep.mubr.msk.f32.mxu1 %vm1526_vm0, %v1527_v1 }
  0xc4   : > { %1119 = vmatprep.mubr.msk.f32.mxu0 %vm1526_vm0, %v1527_v1  ;;  %1182 = vmatpush3.bf16.msra.mxu0 %v1181_v2 }
  0xc5   : > { %1183 = vmatprep.subr.bf16.mxu0 %v1525_v0 }
  0xc8   : > { %1185 = vmatpush3.bf16.msra.mxu0 %v1184_v4 }
  0xc9   : > { %1186 = vmatprep.subr.bf16.mxu0 %v1525_v0 }
  0xcc   : > { %1188 = vmatpush3.bf16.msra.mxu0 %v1187_v7 }
  0xcd   : > { %1189 = vmatprep.subr.bf16.mxu0 %v1525_v0 }
  0xd0   : > { %1191 = vmatpush3.bf16.msra.mxu0 %v1190_v10 }
  0xd1   : > { %1192 = vmatprep.subr.bf16.mxu0 %v1525_v0 }
 0x195   : > { %v578_v55 = vpop.f32.mrb[0].mxu1 }
 0x196   : > { %v579_v56 = vadd.f32 %v955_v53, %v578_v55  ;;  %v1086_v57 = vpop.f32.mrb[1].mxu1  ;;  %v501_v58 = vpop.f32.mrb[0].mxu0 }
 0x197   : > { %v502_v59 = vadd.f32 %v954_v54, %v501_v58  ;;  %v1051_v60 = vpop.f32.mrb[1].mxu0 }
 0x198   : > { %1123 = vmatpush3.xpose.msra.mxu1 %v579_v56 }
 0x199   : > { %1127 = vmatprep.subr.mxu1 %v1527_v1 }
 0x19b   : > { %1125 = vmatmul.mubr.f32.vlgmr.msra.gmra.mrb[2].mxu1 %v502_v59 }
 0x19c   : > { %1129 = vmatprep.mubr.msk.f32.mxu1 %vm1526_vm0, %v1527_v1  ;;  %v420_v1 = vld [vmem:[#allocation10 + $0x40] sm:$0xff] }
 0x19d   : > { %v1193_v12 = vpack.c.bf16 %v421_v11, %v420_v1 }
 0x19f   : > { %1194 = vmatpush3.bf16.msra.mxu0 %v1193_v12 }
 0x1a0   : > { %1195 = vmatprep.subr.bf16.mxu0 %v1525_v0 }
 0x1a3   : > { %1197 = vmatpush3.bf16.msra.mxu0 %v1196_v15 }
 0x1a4   : > { %1198 = vmatprep.subr.bf16.mxu0 %v1525_v0 }
 0x1a7   : > { %1200 = vmatpush3.bf16.msra.mxu0 %v1199_v18 }
 0x1a8   : > { %1201 = vmatprep.subr.bf16.mxu0 %v1525_v0 }
 0x1ab   : > { %1203 = vmatpush3.bf16.msra.mxu0 %v1202_v21 }
 0x1ae   : > { %1120 = vmatmul.mubr.f32.vlgmr.msra.gmra.mrb[2].mxu0 %v379_v52 }
 0x26e   : > { %v725_v22 = vpop.f32.mrb[2].mxu1 }
 0x26f   : > { %v729_v23 = vmul.f32 0.088388346, %v725_v22  ;;  %v1126_v24 = vpop.f32.mrb[3].mxu1 }
 0x271   : > { %v731_v25 = vsel %vm730_vm1, %v729_v23, -inf }
 0x272   : > { %732 = vmax.xlane.f32.xlu0 %v731_v25 }
 0x281   : > { %v655_v0 = vpop.f32.mrb[2].mxu0 }
 0x282   : > { %v1121_v32 = vpop.f32.mrb[3].mxu0  ;;  %v656_v33 = vadd.f32 %v956_v31, %v655_v0 }
 0x284   : > { %1128 = vmatpush3.msra.mxu1 %v656_v33 }
 0x2ff   : > { %v733_v26 = vpop.xlane.xlu0 %732 }
 0x300   : > { %v734_v27 = vsub.f32 %v729_v23, %v733_v26 }
 0x302   : > { %v735_v28 = vmul.f32 1.442695, %v734_v27 }
 0x304   : > { %1296 = vpow2.f32 %v735_v28 }
 0x30e   : > { %v1297_v29 = vpop.eup %1296 }
 0x30f   : > { %v737_v30 = vsel %vm730_vm1, %v1297_v29, 0.0 }
 0x310   : > { %738 = vadd.xlane.f32.xlu0 %v737_v30 }
 0x39d   : > { %v739_v34 = vpop.xlane.xlu0 %738 }
 0x39e   : > { %1298 = vrcp.f32 %v739_v34 }
 0x3a8   : > { %v1299_v35 = vpop.eup %1298 }
 0x3a9   : > { %v741_v36 = vmul.f32 %v1299_v35, %v1297_v29 }
 0x3ab   : > { %1130 = vmatmul.mubr.msk.f32.vlgmr.msra.gmra.mrb[4].mxu1 %vm730_vm1, %v741_v36 }
 0x47e   : > { %v811_v37 = vpop.f32.mrb[4].mxu1 }
 0x47f   : > { %815 = vst [vmem:[%s376_s26] sm:$0xff] %v811_v37  ;;  %v1131_v38 = vpop.f32.mrb[5].mxu1 }
 0x480   : > { %1455 = shalt.err (!%p1452_p1)
}
 0x481   : > { %s1456_s1 = scalar_lea.hbm %s1869_s17, 128  ;;  %s1460_s18 = scalar_lea.hbm %s1919_s8, 256 }
 0x482   : > { %p1457_p3 = scmp.ne.s32.totalorder %s1869_s17, %s1456_s1  ;;  %p1461_p0 = scmp.lt.u32.totalorder %s1869_s17, %s1919_s8 }
 0x483   : > { %p1462_p2 = scmp.lt.u32.totalorder %s1460_s18, %s1456_s1  ;;  %p1464_p6 = scmp.lt.u32.totalorder %s1456_s1, %s1869_s17 }
 0x484   : > { %p1458_p9 = pnand %p1457_p3, %p1939_p10 }
 0x485   : > { %p1463_p8 = por %p1462_p2, %p1461_p0 }
 0x486   : > { %p1459_p13 = pneg %p1458_p9 }
 0x487   : > { %p1465_p11 = por %p1464_p6, %p1463_p8 }
 0x489   : > { %p1466_p12 = pnand %p1465_p11, %p1459_p13 }
 0x48b   : > { %1469 = shalt.err (!%p1466_p12)
}
 0x48c   : > { %1222 = dma.vmem_to_hbm [thread:$0]  (%p1939_p10), %s1864_s9, 128, %s1869_s17, %s817_s12  }
 0x48d PF: > { %s842_s24 = sand.u32 1, %s1504_s27   ;;  %p1940_p5 = scmp.ne.s32.totalorder %s1932_s21, 0 }
 0x48e   : > { %p1941_p7 = scmp.ge.s32.totalorder %s1516_s30, 2  ;;  %s843_s20 = scalar_lea.sflag [#allocation4], %s842_s24 }
 0x490   : > { %p1242_p4 = pnand %p1941_p7, %p1940_p5 }
 0x492   : > { %1499 = dma.done.wait (!%p1242_p4), %s843_s20, 128  }
 0x493   : > { %1501 = vsyncadd (!%p1242_p4), %s843_s20, 4294967168  ;;  %p23_p1 = scmp.ge.s32.totalorder %s1716_s23, 4   ;;  %s1942_s27 = smov %s1508_s28 }
 0x494   : > { %s1943_s28 = smov %s1512_s29  ;;  %s1944_s29 = smov %s1727_s19 }
 0x495   : > { %s1945_s30 = smov %s1716_s23  ;;  %25 = sbr.rel (!%p23_p1) target bundleno = 9 (0x9), region = 113 }
 0x49c   :  { %848 = vsyncpa [#allocation3], 1 }
 0x49d   :  { %850 = vsyncpa [#allocation3 + $0x1], 1 }
 0x49e   :  { %851 = vsyncpa [#allocation6], 1 }
 0x49f   :  { %852 = vsyncpa [#allocation9], 1 }
 0x4a0   :  { %853 = vsyncpa [#allocation4], 1 }
 0x4a1   :  { %855 = vsyncpa [#allocation4 + $0x1], 1 }

</bundles_post_ra>
